<compile_context>
chip_gen: v7x
topology: tpu7x:2x2x1
jax: 0.10.0
libtpu: 0.0.40
codegen_flags: <defaults>
</compile_context>

<pallas_src>
import functools
import math

import jax
import jax.numpy as jnp
from jax.experimental import pallas as pl
from jax.experimental.pallas import tpu as pltpu

_BN_EPS = 1e-5

_TAPS = ((-1, -1), (-1, 0), (-1, 1),
         (0, -1), (0, 0), (0, 1),
         (1, -1), (1, 0), (1, 1))


# ---------------------------------------------------------------------------
# The fused kernel: one grid step = imgs_per_step images.
# ---------------------------------------------------------------------------
def _cs_layer_kernel(f_ref, wc_ref, cshift_ref, w1_ref, s1_ref,
                     w3_ref, wh_ref, sh_ref,
                     heads_ref, fea_ref, *, H, W):
    cdt = f_ref.dtype                      # matmul operand dtype (bf16 or f32)
    lanes = f_ref.shape[-1]                # imgs_per_step * H * W
    hw = H * W

    # --- conv: 1x1 (inp1+inp2 -> mid) + folded BN + ReLU (single dot) -------
    x = jnp.dot(wc_ref[...], f_ref[...], preferred_element_type=jnp.float32)
    x = jnp.maximum(x + cshift_ref[...], 0.0)                  # (mid, lanes) f32

    # --- conv_1: 1x1 (mid -> out_ch) + folded BN + ReLU ----------------------
    fea = jnp.dot(w1_ref[...], x.astype(cdt),
                  preferred_element_type=jnp.float32)
    fea = jnp.maximum(fea + s1_ref[...], 0.0)                  # (out_ch, lanes) f32
    fea_ref[...] = fea.astype(fea_ref.dtype)

    # --- merged 3x3 conv (out_ch -> 2*out_ch), padding=1, folded BN + ReLU ---
    # Nine taps = nine XLU lane-rolls of the fea tile + position masks for the
    # per-image borders.  Images are packed contiguously on the lane axis, so
    # the same masks also zero all cross-image / circular-wrap reads.
    # Tap dots accumulate into an f32 accumulator; no im2col is materialized.
    fea_c = fea.astype(cdt)
    pos = jax.lax.broadcasted_iota(jnp.int32, (1, lanes), 1)
    sp = pos % hw                          # flattened position inside an image
    colv = pos % W
    not_top = sp >= W
    not_bottom = sp < hw - W
    not_left = colv != 0
    not_right = colv != W - 1

    cout2 = w3_ref.shape[1]
    zero = jnp.zeros((), cdt)
    b = jnp.zeros((cout2, lanes), jnp.float32)
    for t, (dy, dx) in enumerate(_TAPS):
        off = dy * W + dx                  # patch[p] = fea[p + off] (masked)
        patch = fea_c if off == 0 else pltpu.roll(fea_c, (-off) % lanes, axis=1)
        mask = None
        if dy == -1:
            mask = not_top
        elif dy == 1:
            mask = not_bottom
        if dx == -1:
            mask = not_left if mask is None else jnp.logical_and(mask, not_left)
        elif dx == 1:
            mask = not_right if mask is None else jnp.logical_and(mask, not_right)
        if mask is not None:
            patch = jnp.where(mask, patch, zero)
        b = b + jnp.dot(w3_ref[t], patch, preferred_element_type=jnp.float32)
    b = jnp.maximum(b, 0.0)     # 3x3 BN shift is identically zero -> no s3 add
    # Dropout(0.1) is the identity in eval mode.

    # --- merged 1x1 heads: sublane-padded block-diagonal weight, one store ---
    heads = jnp.dot(wh_ref[...], b.astype(cdt),
                    preferred_element_type=jnp.float32)
    heads_ref[...] = (heads + sh_ref[...]).astype(heads_ref.dtype)


# ---------------------------------------------------------------------------
# Wrapper: one pallas_call for the whole forward; returns [x, x_1, fea_] NCHW.
# ---------------------------------------------------------------------------
def _pick_imgs_per_step(n, hw):
    """Smallest #images fused per grid step that makes the lane axis 128-dense."""
    if hw % 128 == 0:
        return 1
    for b in range(1, n + 1):
        if n % b == 0 and (b * hw) % 128 == 0:
            return b
    return n   # no divisor gives lane density; fuse the whole (small) batch.


def _w_spec(a):
    zeros = (0,) * a.ndim
    return pl.BlockSpec(a.shape, lambda g, _z=zeros: _z)


def cs_layer_forward(params, f1_nchw, f2_nchw, *, imgs_per_step=None):
    n, inp1, h, w = f1_nchw.shape
    inp2 = f2_nchw.shape[1]
    hw = h * w
    cin = inp1 + inp2
    mid = params["wc"].shape[0]
    out_ch = params["w1"].shape[0]
    nclass = params["nclass"]
    head_pad = params["head_w"].shape[0]
    cdt = params["w1"].dtype

    b_img = imgs_per_step or _pick_imgs_per_step(n, hw)
    assert n % b_img == 0
    g = n // b_img
    lanes = b_img * hw

    # Channel concat + lane packing (b_img images side by side on the lane
    # axis) is pure XLA layout plumbing outside the kernel.
    f = jnp.concatenate([f1_nchw, f2_nchw], axis=1).reshape(n, cin, hw)
    f = f.reshape(g, b_img, cin, hw).transpose(0, 2, 1, 3).reshape(g, cin, lanes)
    f = f.astype(cdt)

    weights = (params["wc"], params["cshift"], params["w1"], params["s1"],
               params["w3"], params["head_w"], params["head_shift"])
    weight_bytes = sum(int(a.size) * a.dtype.itemsize for a in weights)

    # Scoped-VMEM budget: double-buffered I/O blocks + live temporaries +
    # resident weights, generous headroom, clamped to [32 MiB, 64 MiB].
    est = (2 * cin * lanes * jnp.dtype(cdt).itemsize
           + 2 * (head_pad + out_ch) * lanes * 4
           + (mid + 3 * out_ch + 2 * out_ch) * lanes * 4
           + weight_bytes)
    vmem_limit = int(min(max(8 * est, 32 * 1024 * 1024), 64 * 1024 * 1024))

    flops = 2 * n * hw * (mid * cin + out_ch * mid
                          + (2 * out_ch) * (9 * out_ch)
                          + head_pad * (2 * out_ch))
    bytes_accessed = (int(f.size) * f.dtype.itemsize
                      + n * (head_pad + out_ch) * hw * 4 + weight_bytes)

    kernel = functools.partial(_cs_layer_kernel, H=h, W=w)

    heads, fea = pl.pallas_call(
        kernel,
        out_shape=(
            jax.ShapeDtypeStruct((g, head_pad, lanes), jnp.float32),
            jax.ShapeDtypeStruct((g, out_ch, lanes), jnp.float32),
        ),
        grid=(g,),
        in_specs=[
            pl.BlockSpec((None, cin, lanes), lambda i: (i, 0, 0)),
            _w_spec(params["wc"]), _w_spec(params["cshift"]),
            _w_spec(params["w1"]), _w_spec(params["s1"]),
            _w_spec(params["w3"]),
            _w_spec(params["head_w"]), _w_spec(params["head_shift"]),
        ],
        out_specs=(
            pl.BlockSpec((None, head_pad, lanes), lambda i: (i, 0, 0)),
            pl.BlockSpec((None, out_ch, lanes), lambda i: (i, 0, 0)),
        ),
        compiler_params=pltpu.CompilerParams(
            dimension_semantics=("parallel",),
            vmem_limit_bytes=vmem_limit,
        ),
        cost_estimate=pl.CostEstimate(
            flops=int(flops), transcendentals=0,
            bytes_accessed=int(bytes_accessed)),
    )(f, *weights)

    # Un-pack lanes -> (N, C, H, W) and split the padded head block (free XLA).
    heads = heads.reshape(g, head_pad, b_img, hw).transpose(0, 2, 1, 3)
    heads = heads.reshape(n, head_pad, h, w)
    fea = fea.reshape(g, out_ch, b_img, hw).transpose(0, 2, 1, 3)
    fea = fea.reshape(n, out_ch, h, w)
    return [heads[:, :nclass], heads[:, nclass:nclass + 1], fea]


# ---------------------------------------------------------------------------
# Deterministic parameter construction (mirrors cs_layer.__init__ shapes)
# plus BN/bias folding into the fused-kernel layout.
# ---------------------------------------------------------------------------
def make_raw_params(key, inp1, inp2, out_channels, nclass):
    mid = int((inp1 + inp2) / 2)
    ks = jax.random.split(key, 10)

    def xavier(k, cout, cin, kh, kw):
        std = math.sqrt(2.0 / (cin * kh * kw + cout * kh * kw))
        return std * jax.random.normal(k, (cout, cin, kh, kw), jnp.float32)

    def bias(k, cout, cin, kh, kw):
        bound = 1.0 / math.sqrt(cin * kh * kw)
        return jax.random.uniform(k, (cout,), jnp.float32, -bound, bound)

    return {
        "conv_w": xavier(ks[0], mid, inp1 + inp2, 1, 1),
        "conv_b": bias(ks[1], mid, inp1 + inp2, 1, 1),
        "conv1_w": xavier(ks[2], out_channels, mid, 1, 1),
        "conv1_b": bias(ks[3], out_channels, mid, 1, 1),
        "blk_w3": xavier(ks[4], out_channels, out_channels, 3, 3),
        "blk_head_w": xavier(ks[5], nclass, out_channels, 1, 1),
        "blk_head_b": bias(ks[6], nclass, out_channels, 1, 1),
        "blk1_w3": xavier(ks[7], out_channels, out_channels, 3, 3),
        "blk1_head_w": xavier(ks[8], 1, out_channels, 1, 1),
        "blk1_head_b": bias(ks[9], 1, out_channels, 1, 1),
    }


def fold_params(raw, out_channels, nclass, *, compute_dtype=jnp.bfloat16):
    s = 1.0 / math.sqrt(1.0 + _BN_EPS)  # eval BN: gamma=1, beta=0, mean=0, var=1
    head_pad = ((nclass + 1 + 7) // 8) * 8
    p = {"nclass": nclass}

    # conv / conv_1: fold BN scale into weight, bias*scale into per-chan shift.
    p["wc"] = (raw["conv_w"][:, :, 0, 0] * s).astype(compute_dtype)
    p["cshift"] = (raw["conv_b"] * s).reshape(-1, 1).astype(jnp.float32)
    p["w1"] = (raw["conv1_w"][:, :, 0, 0] * s).astype(compute_dtype)
    p["s1"] = (raw["conv1_b"] * s).reshape(-1, 1).astype(jnp.float32)

    # merged 3x3 (block ++ block_1) laid out as (tap, cout, cin) so the kernel
    # indexes a clean (2*out_ch, out_ch) tile per tap (no lane slicing).
    def fold3(wt):  # (cout, cin, 3, 3) -> (9, cout, cin), tap = (dy+1)*3+(dx+1)
        return jnp.transpose(wt * s, (2, 3, 0, 1)).reshape(9, wt.shape[0], wt.shape[1])
    p["w3"] = jnp.concatenate(
        [fold3(raw["blk_w3"]), fold3(raw["blk1_w3"])], axis=1).astype(compute_dtype)
    # (3x3 BN shift is identically zero: no conv bias, beta=0 -> removed.)

    # merged heads: block-diagonal, sublane-padded to a multiple of 8 rows.
    head_w = jnp.zeros((head_pad, 2 * out_channels), jnp.float32)
    head_w = head_w.at[:nclass, :out_channels].set(raw["blk_head_w"][:, :, 0, 0])
    head_w = head_w.at[nclass, out_channels:].set(raw["blk1_head_w"][0, :, 0, 0])
    p["head_w"] = head_w.astype(compute_dtype)

    head_b = jnp.zeros((head_pad, 1), jnp.float32)
    head_b = head_b.at[:nclass, 0].set(raw["blk_head_b"])
    head_b = head_b.at[nclass, 0].set(raw["blk1_head_b"][0])
    p["head_shift"] = head_b
    return p


# ---------------------------------------------------------------------------
# Pure-JAX reference (lax.conv) for in-script validation.
# ---------------------------------------------------------------------------
def _conv2d_nchw(x, w, b=None, pad=0):
    out = jax.lax.conv_general_dilated(
        x, w, window_strides=(1, 1), padding=[(pad, pad), (pad, pad)],
        dimension_numbers=("NCHW", "OIHW", "NCHW"))
    if b is not None:
        out = out + b.reshape(1, -1, 1, 1)
    return out


def _bn_eval(x):
    return x * (1.0 / math.sqrt(1.0 + _BN_EPS))


def reference_forward(raw, f1, f2):
    x = jnp.concatenate([f1, f2], axis=1)
    x = jax.nn.relu(_bn_eval(_conv2d_nchw(x, raw["conv_w"], raw["conv_b"])))
    fea = jax.nn.relu(_bn_eval(_conv2d_nchw(x, raw["conv1_w"], raw["conv1_b"])))
    b = jax.nn.relu(_bn_eval(_conv2d_nchw(fea, raw["blk_w3"], pad=1)))
    x_out = _conv2d_nchw(b, raw["blk_head_w"], raw["blk_head_b"])
    b1 = jax.nn.relu(_bn_eval(_conv2d_nchw(fea, raw["blk1_w3"], pad=1)))
    x1_out = _conv2d_nchw(b1, raw["blk1_head_w"], raw["blk1_head_b"])
    return x_out, x1_out, fea


if __name__ == "__main__":
    # Small shapes consistent with the module: batch=2, inp1=inp2=4, 8x8 spatial,
    # out_channels=16, nclass=5.
    inp1, inp2, out_channels, nclass = 4, 4, 16, 5
    N, H, W = 2, 8, 8

    key = jax.random.PRNGKey(0)
    k_params, k_f1, k_f2 = jax.random.split(key, 3)
    raw = make_raw_params(k_params, inp1, inp2, out_channels, nclass)

    f_1 = jax.random.normal(k_f1, (N, inp1, H, W), jnp.float32)
    f_2 = jax.random.normal(k_f2, (N, inp2, H, W), jnp.float32)
    refs = reference_forward(raw, f_1, f_2)

    # f32 path checks the kernel logic with a tight bound (tolerance still
    # allows for reduced-precision MXU passes on f32 operands); bf16 is the
    # production (MXU-native) path with a correspondingly looser tolerance.
    for compute_dtype, tol in ((jnp.float32, 1e-2), (jnp.bfloat16, 2.5e-2)):
        params = fold_params(raw, out_channels, nclass, compute_dtype=compute_dtype)
        outs = cs_layer_forward(params, f_1, f_2)
        jax.block_until_ready(outs)
        x, x_1, fea_ = outs

        assert x.shape == (N, nclass, H, W)
        assert x_1.shape == (N, 1, H, W)
        assert fea_.shape == (N, out_channels, H, W)

        for got, ref in zip((x, x_1, fea_), refs):
            rel = float(jnp.linalg.norm(got.astype(jnp.float32) - ref)
                        / (jnp.linalg.norm(ref) + 1e-12))
            assert rel < tol, f"{compute_dtype}: relative error too large: {rel}"

    print("KERNEL_OK")
</pallas_src>

<mosaic_0001>
module attributes {stable_mosaic.version = 11 : i64} {
  func.func @_cs_layer_kernel(%arg0: i32, %arg1: memref<1x8x128xf32, #tpu.memory_space<vmem>>, %arg2: memref<4x8xf32, #tpu.memory_space<vmem>>, %arg3: memref<4x1xf32, #tpu.memory_space<vmem>>, %arg4: memref<16x4xf32, #tpu.memory_space<vmem>>, %arg5: memref<16x1xf32, #tpu.memory_space<vmem>>, %arg6: memref<9x32x16xf32, #tpu.memory_space<vmem>>, %arg7: memref<8x32xf32, #tpu.memory_space<vmem>>, %arg8: memref<8x1xf32, #tpu.memory_space<vmem>>, %arg9: memref<1x8x128xf32, #tpu.memory_space<vmem>>, %arg10: memref<1x16x128xf32, #tpu.memory_space<vmem>>) attributes {dimension_semantics = [#tpu.dimension_semantics<parallel>], iteration_bounds = array<i64: 1>, scalar_prefetch = 0 : i64, scratch_operands = 0 : i64, tpu.core_type = #tpu.core_type<tc>, window_params = [{transform_indices = @transform_0, window_bounds = array<i64: 1, 8, 128>}, {pipeline_mode = #tpu.pipeline_mode<synchronous>, transform_indices = @transform_1, window_bounds = array<i64: 4, 8>}, {pipeline_mode = #tpu.pipeline_mode<synchronous>, transform_indices = @transform_2, window_bounds = array<i64: 4, 1>}, {pipeline_mode = #tpu.pipeline_mode<synchronous>, transform_indices = @transform_3, window_bounds = array<i64: 16, 4>}, {pipeline_mode = #tpu.pipeline_mode<synchronous>, transform_indices = @transform_4, window_bounds = array<i64: 16, 1>}, {pipeline_mode = #tpu.pipeline_mode<synchronous>, transform_indices = @transform_5, window_bounds = array<i64: 9, 32, 16>}, {pipeline_mode = #tpu.pipeline_mode<synchronous>, transform_indices = @transform_6, window_bounds = array<i64: 8, 32>}, {pipeline_mode = #tpu.pipeline_mode<synchronous>, transform_indices = @transform_7, window_bounds = array<i64: 8, 1>}, {transform_indices = @transform_8, window_bounds = array<i64: 1, 8, 128>}, {transform_indices = @transform_9, window_bounds = array<i64: 1, 16, 128>}]} {
    %c0 = arith.constant 0 : index
    %c0_0 = arith.constant 0 : index
    %0 = vector.load %arg2[%c0, %c0_0] : memref<4x8xf32, #tpu.memory_space<vmem>>, vector<4x8xf32>
    %c0_1 = arith.constant 0 : index
    %c0_2 = arith.constant 0 : index
    %c0_3 = arith.constant 0 : index
    %1 = vector.load %arg1[%c0_1, %c0_2, %c0_3] : memref<1x8x128xf32, #tpu.memory_space<vmem>>, vector<1x8x128xf32>
    %2 = vector.shape_cast %1 : vector<1x8x128xf32> to vector<8x128xf32>
    %cst = arith.constant dense<0.000000e+00> : vector<4x128xf32>
    %3 = tpu.matmul %0, %2, %cst {dimension_numbers = #tpu.dot_dimension_numbers<[1], [0], [0], [1], [0, 0, 1, 1], [], []>} : vector<4x8xf32>, vector<8x128xf32>, vector<4x128xf32> -> vector<4x128xf32>
    %c0_4 = arith.constant 0 : index
    %c0_5 = arith.constant 0 : index
    %4 = vector.load %arg3[%c0_4, %c0_5] : memref<4x1xf32, #tpu.memory_space<vmem>>, vector<4x1xf32>
    %5 = vector.broadcast %4 : vector<4x1xf32> to vector<4x128xf32>
    %6 = arith.addf %3, %5 : vector<4x128xf32>
    %cst_6 = arith.constant 0.000000e+00 : f32
    %7 = vector.broadcast %cst_6 : f32 to vector<4x128xf32>
    %8 = arith.maximumf %6, %7 : vector<4x128xf32>
    %c0_7 = arith.constant 0 : index
    %c0_8 = arith.constant 0 : index
    %9 = vector.load %arg4[%c0_7, %c0_8] : memref<16x4xf32, #tpu.memory_space<vmem>>, vector<16x4xf32>
    %cst_9 = arith.constant dense<0.000000e+00> : vector<16x128xf32>
    %10 = tpu.matmul %9, %8, %cst_9 {dimension_numbers = #tpu.dot_dimension_numbers<[1], [0], [0], [1], [0, 0, 1, 1], [], []>} : vector<16x4xf32>, vector<4x128xf32>, vector<16x128xf32> -> vector<16x128xf32>
    %c0_10 = arith.constant 0 : index
    %c0_11 = arith.constant 0 : index
    %11 = vector.load %arg5[%c0_10, %c0_11] : memref<16x1xf32, #tpu.memory_space<vmem>>, vector<16x1xf32>
    %12 = vector.broadcast %11 : vector<16x1xf32> to vector<16x128xf32>
    %13 = arith.addf %10, %12 : vector<16x128xf32>
    %cst_12 = arith.constant 0.000000e+00 : f32
    %14 = vector.broadcast %cst_12 : f32 to vector<16x128xf32>
    %15 = arith.maximumf %13, %14 : vector<16x128xf32>
    %c0_13 = arith.constant 0 : index
    %c0_14 = arith.constant 0 : index
    %c0_15 = arith.constant 0 : index
    %16 = vector.load %arg10[%c0_13, %c0_14, %c0_15] : memref<1x16x128xf32, #tpu.memory_space<vmem>>, vector<1x16x128xf32>
    %17 = vector.shape_cast %16 : vector<1x16x128xf32> to vector<16x128xf32>
    %18 = vector.shape_cast %15 : vector<16x128xf32> to vector<1x16x128xf32>
    tpu.vector_store %arg10[%c0_13, %c0_14, %c0_15], %18 {strides = array<i32>} : memref<1x16x128xf32, #tpu.memory_space<vmem>>, vector<1x16x128xf32>,
    %19 = tpu.iota {dimensions = array<i32: 1>} : vector<1x128xi32>
    %c64_i32 = arith.constant 64 : i32
    %c0_i32 = arith.constant 0 : i32
    %20 = arith.cmpi eq, %c64_i32, %c0_i32 : i32
    %c1_i32 = arith.constant 1 : i32
    %21 = arith.select %20, %c1_i32, %c64_i32 : i32
    %22 = vector.broadcast %21 : i32 to vector<1x128xi32>
    %23 = arith.remsi %19, %22 : vector<1x128xi32>
    %c0_i32_16 = arith.constant 0 : i32
    %24 = vector.broadcast %c0_i32_16 : i32 to vector<1x128xi32>
    %25 = arith.cmpi ne, %23, %24 : vector<1x128xi32>
    %c0_i32_17 = arith.constant 0 : i32
    %26 = vector.broadcast %c0_i32_17 : i32 to vector<1x128xi32>
    %27 = arith.cmpi slt, %23, %26 : vector<1x128xi32>
    %c0_i32_18 = arith.constant 0 : i32
    %28 = arith.cmpi slt, %21, %c0_i32_18 : i32
    %29 = vector.broadcast %28 : i1 to vector<1x128xi1>
    %30 = vector.broadcast %29 : vector<1x128xi1> to vector<1x128xi1>
    %31 = arith.xori %27, %30 : vector<1x128xi1>
    %32 = arith.andi %31, %25 : vector<1x128xi1>
    %33 = vector.broadcast %21 : i32 to vector<1x128xi32>
    %34 = arith.addi %23, %33 : vector<1x128xi32>
    %35 = arith.select %32, %34, %23 : vector<1x128xi1>, vector<1x128xi32>
    %c8_i32 = arith.constant 8 : i32
    %c0_i32_19 = arith.constant 0 : i32
    %36 = arith.cmpi eq, %c8_i32, %c0_i32_19 : i32
    %c1_i32_20 = arith.constant 1 : i32
    %37 = arith.select %36, %c1_i32_20, %c8_i32 : i32
    %38 = vector.broadcast %37 : i32 to vector<1x128xi32>
    %39 = arith.remsi %19, %38 : vector<1x128xi32>
    %c0_i32_21 = arith.constant 0 : i32
    %40 = vector.broadcast %c0_i32_21 : i32 to vector<1x128xi32>
    %41 = arith.cmpi ne, %39, %40 : vector<1x128xi32>
    %c0_i32_22 = arith.constant 0 : i32
    %42 = vector.broadcast %c0_i32_22 : i32 to vector<1x128xi32>
    %43 = arith.cmpi slt, %39, %42 : vector<1x128xi32>
    %c0_i32_23 = arith.constant 0 : i32
    %44 = arith.cmpi slt, %37, %c0_i32_23 : i32
    %45 = vector.broadcast %44 : i1 to vector<1x128xi1>
    %46 = vector.broadcast %45 : vector<1x128xi1> to vector<1x128xi1>
    %47 = arith.xori %43, %46 : vector<1x128xi1>
    %48 = arith.andi %47, %41 : vector<1x128xi1>
    %49 = vector.broadcast %37 : i32 to vector<1x128xi32>
    %50 = arith.addi %39, %49 : vector<1x128xi32>
    %51 = arith.select %48, %50, %39 : vector<1x128xi1>, vector<1x128xi32>
    %c8_i32_24 = arith.constant 8 : i32
    %52 = vector.broadcast %c8_i32_24 : i32 to vector<1x128xi32>
    %53 = arith.cmpi sge, %35, %52 : vector<1x128xi32>
    %c56_i32 = arith.constant 56 : i32
    %54 = vector.broadcast %c56_i32 : i32 to vector<1x128xi32>
    %55 = arith.cmpi slt, %35, %54 : vector<1x128xi32>
    %c0_i32_25 = arith.constant 0 : i32
    %56 = vector.broadcast %c0_i32_25 : i32 to vector<1x128xi32>
    %57 = arith.cmpi ne, %51, %56 : vector<1x128xi32>
    %c7_i32 = arith.constant 7 : i32
    %58 = vector.broadcast %c7_i32 : i32 to vector<1x128xi32>
    %59 = arith.cmpi ne, %51, %58 : vector<1x128xi32>
    %cst_26 = arith.constant 0.000000e+00 : f32
    %60 = vector.broadcast %cst_26 : f32 to vector<32x128xf32>
    %c9_i32 = arith.constant 9 : i32
    %61 = tpu.dynamic_rotate %15 by %c9_i32 dim 1 : vector<16x128xf32>, i32 -> vector<16x128xf32>
    %62 = arith.andi %53, %57 : vector<1x128xi1>
    %cst_27 = arith.constant 0.000000e+00 : f32
    %63 = vector.shape_cast %62 : vector<1x128xi1> to vector<1x128xi1>
    %64 = vector.broadcast %63 : vector<1x128xi1> to vector<16x128xi1>
    %65 = vector.broadcast %cst_27 : f32 to vector<16x128xf32>
    %66 = arith.select %64, %61, %65 : vector<16x128xi1>, vector<16x128xf32>
    %c0_28 = arith.constant 0 : index
    %c0_29 = arith.constant 0 : index
    %c0_30 = arith.constant 0 : index
    %67 = vector.load %arg6[%c0_28, %c0_29, %c0_30] : memref<9x32x16xf32, #tpu.memory_space<vmem>>, vector<1x32x16xf32>
    %68 = vector.shape_cast %67 : vector<1x32x16xf32> to vector<32x16xf32>
    %cst_31 = arith.constant dense<0.000000e+00> : vector<32x128xf32>
    %69 = tpu.matmul %68, %66, %cst_31 {dimension_numbers = #tpu.dot_dimension_numbers<[1], [0], [0], [1], [0, 0, 1, 1], [], []>} : vector<32x16xf32>, vector<16x128xf32>, vector<32x128xf32> -> vector<32x128xf32>
    %70 = arith.addf %60, %69 : vector<32x128xf32>
    %c8_i32_32 = arith.constant 8 : i32
    %71 = tpu.dynamic_rotate %15 by %c8_i32_32 dim 1 : vector<16x128xf32>, i32 -> vector<16x128xf32>
    %cst_33 = arith.constant 0.000000e+00 : f32
    %72 = vector.shape_cast %53 : vector<1x128xi1> to vector<1x128xi1>
    %73 = vector.broadcast %72 : vector<1x128xi1> to vector<16x128xi1>
    %74 = vector.broadcast %cst_33 : f32 to vector<16x128xf32>
    %75 = arith.select %73, %71, %74 : vector<16x128xi1>, vector<16x128xf32>
    %c1 = arith.constant 1 : index
    %c0_34 = arith.constant 0 : index
    %c0_35 = arith.constant 0 : index
    %76 = vector.load %arg6[%c1, %c0_34, %c0_35] : memref<9x32x16xf32, #tpu.memory_space<vmem>>, vector<1x32x16xf32>
    %77 = vector.shape_cast %76 : vector<1x32x16xf32> to vector<32x16xf32>
    %cst_36 = arith.constant dense<0.000000e+00> : vector<32x128xf32>
    %78 = tpu.matmul %77, %75, %cst_36 {dimension_numbers = #tpu.dot_dimension_numbers<[1], [0], [0], [1], [0, 0, 1, 1], [], []>} : vector<32x16xf32>, vector<16x128xf32>, vector<32x128xf32> -> vector<32x128xf32>
    %79 = arith.addf %70, %78 : vector<32x128xf32>
    %c7_i32_37 = arith.constant 7 : i32
    %80 = tpu.dynamic_rotate %15 by %c7_i32_37 dim 1 : vector<16x128xf32>, i32 -> vector<16x128xf32>
    %81 = arith.andi %53, %59 : vector<1x128xi1>
    %cst_38 = arith.constant 0.000000e+00 : f32
    %82 = vector.shape_cast %81 : vector<1x128xi1> to vector<1x128xi1>
    %83 = vector.broadcast %82 : vector<1x128xi1> to vector<16x128xi1>
    %84 = vector.broadcast %cst_38 : f32 to vector<16x128xf32>
    %85 = arith.select %83, %80, %84 : vector<16x128xi1>, vector<16x128xf32>
    %c2 = arith.constant 2 : index
    %c0_39 = arith.constant 0 : index
    %c0_40 = arith.constant 0 : index
    %86 = vector.load %arg6[%c2, %c0_39, %c0_40] : memref<9x32x16xf32, #tpu.memory_space<vmem>>, vector<1x32x16xf32>
    %87 = vector.shape_cast %86 : vector<1x32x16xf32> to vector<32x16xf32>
    %cst_41 = arith.constant dense<0.000000e+00> : vector<32x128xf32>
    %88 = tpu.matmul %87, %85, %cst_41 {dimension_numbers = #tpu.dot_dimension_numbers<[1], [0], [0], [1], [0, 0, 1, 1], [], []>} : vector<32x16xf32>, vector<16x128xf32>, vector<32x128xf32> -> vector<32x128xf32>
    %89 = arith.addf %79, %88 : vector<32x128xf32>
    %c1_i32_42 = arith.constant 1 : i32
    %90 = tpu.dynamic_rotate %15 by %c1_i32_42 dim 1 : vector<16x128xf32>, i32 -> vector<16x128xf32>
    %cst_43 = arith.constant 0.000000e+00 : f32
    %91 = vector.shape_cast %57 : vector<1x128xi1> to vector<1x128xi1>
    %92 = vector.broadcast %91 : vector<1x128xi1> to vector<16x128xi1>
    %93 = vector.broadcast %cst_43 : f32 to vector<16x128xf32>
    %94 = arith.select %92, %90, %93 : vector<16x128xi1>, vector<16x128xf32>
    %c3 = arith.constant 3 : index
    %c0_44 = arith.constant 0 : index
    %c0_45 = arith.constant 0 : index
    %95 = vector.load %arg6[%c3, %c0_44, %c0_45] : memref<9x32x16xf32, #tpu.memory_space<vmem>>, vector<1x32x16xf32>
    %96 = vector.shape_cast %95 : vector<1x32x16xf32> to vector<32x16xf32>
    %cst_46 = arith.constant dense<0.000000e+00> : vector<32x128xf32>
    %97 = tpu.matmul %96, %94, %cst_46 {dimension_numbers = #tpu.dot_dimension_numbers<[1], [0], [0], [1], [0, 0, 1, 1], [], []>} : vector<32x16xf32>, vector<16x128xf32>, vector<32x128xf32> -> vector<32x128xf32>
    %98 = arith.addf %89, %97 : vector<32x128xf32>
    %c4 = arith.constant 4 : index
    %c0_47 = arith.constant 0 : index
    %c0_48 = arith.constant 0 : index
    %99 = vector.load %arg6[%c4, %c0_47, %c0_48] : memref<9x32x16xf32, #tpu.memory_space<vmem>>, vector<1x32x16xf32>
    %100 = vector.shape_cast %99 : vector<1x32x16xf32> to vector<32x16xf32>
    %cst_49 = arith.constant dense<0.000000e+00> : vector<32x128xf32>
    %101 = tpu.matmul %100, %15, %cst_49 {dimension_numbers = #tpu.dot_dimension_numbers<[1], [0], [0], [1], [0, 0, 1, 1], [], []>} : vector<32x16xf32>, vector<16x128xf32>, vector<32x128xf32> -> vector<32x128xf32>
    %102 = arith.addf %98, %101 : vector<32x128xf32>
    %c127_i32 = arith.constant 127 : i32
    %103 = tpu.dynamic_rotate %15 by %c127_i32 dim 1 : vector<16x128xf32>, i32 -> vector<16x128xf32>
    %cst_50 = arith.constant 0.000000e+00 : f32
    %104 = vector.shape_cast %59 : vector<1x128xi1> to vector<1x128xi1>
    %105 = vector.broadcast %104 : vector<1x128xi1> to vector<16x128xi1>
    %106 = vector.broadcast %cst_50 : f32 to vector<16x128xf32>
    %107 = arith.select %105, %103, %106 : vector<16x128xi1>, vector<16x128xf32>
    %c5 = arith.constant 5 : index
    %c0_51 = arith.constant 0 : index
    %c0_52 = arith.constant 0 : index
    %108 = vector.load %arg6[%c5, %c0_51, %c0_52] : memref<9x32x16xf32, #tpu.memory_space<vmem>>, vector<1x32x16xf32>
    %109 = vector.shape_cast %108 : vector<1x32x16xf32> to vector<32x16xf32>
    %cst_53 = arith.constant dense<0.000000e+00> : vector<32x128xf32>
    %110 = tpu.matmul %109, %107, %cst_53 {dimension_numbers = #tpu.dot_dimension_numbers<[1], [0], [0], [1], [0, 0, 1, 1], [], []>} : vector<32x16xf32>, vector<16x128xf32>, vector<32x128xf32> -> vector<32x128xf32>
    %111 = arith.addf %102, %110 : vector<32x128xf32>
    %c121_i32 = arith.constant 121 : i32
    %112 = tpu.dynamic_rotate %15 by %c121_i32 dim 1 : vector<16x128xf32>, i32 -> vector<16x128xf32>
    %113 = arith.andi %55, %57 : vector<1x128xi1>
    %cst_54 = arith.constant 0.000000e+00 : f32
    %114 = vector.shape_cast %113 : vector<1x128xi1> to vector<1x128xi1>
    %115 = vector.broadcast %114 : vector<1x128xi1> to vector<16x128xi1>
    %116 = vector.broadcast %cst_54 : f32 to vector<16x128xf32>
    %117 = arith.select %115, %112, %116 : vector<16x128xi1>, vector<16x128xf32>
    %c6 = arith.constant 6 : index
    %c0_55 = arith.constant 0 : index
    %c0_56 = arith.constant 0 : index
    %118 = vector.load %arg6[%c6, %c0_55, %c0_56] : memref<9x32x16xf32, #tpu.memory_space<vmem>>, vector<1x32x16xf32>
    %119 = vector.shape_cast %118 : vector<1x32x16xf32> to vector<32x16xf32>
    %cst_57 = arith.constant dense<0.000000e+00> : vector<32x128xf32>
    %120 = tpu.matmul %119, %117, %cst_57 {dimension_numbers = #tpu.dot_dimension_numbers<[1], [0], [0], [1], [0, 0, 1, 1], [], []>} : vector<32x16xf32>, vector<16x128xf32>, vector<32x128xf32> -> vector<32x128xf32>
    %121 = arith.addf %111, %120 : vector<32x128xf32>
    %c120_i32 = arith.constant 120 : i32
    %122 = tpu.dynamic_rotate %15 by %c120_i32 dim 1 : vector<16x128xf32>, i32 -> vector<16x128xf32>
    %cst_58 = arith.constant 0.000000e+00 : f32
    %123 = vector.shape_cast %55 : vector<1x128xi1> to vector<1x128xi1>
    %124 = vector.broadcast %123 : vector<1x128xi1> to vector<16x128xi1>
    %125 = vector.broadcast %cst_58 : f32 to vector<16x128xf32>
    %126 = arith.select %124, %122, %125 : vector<16x128xi1>, vector<16x128xf32>
    %c7 = arith.constant 7 : index
    %c0_59 = arith.constant 0 : index
    %c0_60 = arith.constant 0 : index
    %127 = vector.load %arg6[%c7, %c0_59, %c0_60] : memref<9x32x16xf32, #tpu.memory_space<vmem>>, vector<1x32x16xf32>
    %128 = vector.shape_cast %127 : vector<1x32x16xf32> to vector<32x16xf32>
    %cst_61 = arith.constant dense<0.000000e+00> : vector<32x128xf32>
    %129 = tpu.matmul %128, %126, %cst_61 {dimension_numbers = #tpu.dot_dimension_numbers<[1], [0], [0], [1], [0, 0, 1, 1], [], []>} : vector<32x16xf32>, vector<16x128xf32>, vector<32x128xf32> -> vector<32x128xf32>
    %130 = arith.addf %121, %129 : vector<32x128xf32>
    %c119_i32 = arith.constant 119 : i32
    %131 = tpu.dynamic_rotate %15 by %c119_i32 dim 1 : vector<16x128xf32>, i32 -> vector<16x128xf32>
    %132 = arith.andi %55, %59 : vector<1x128xi1>
    %cst_62 = arith.constant 0.000000e+00 : f32
    %133 = vector.shape_cast %132 : vector<1x128xi1> to vector<1x128xi1>
    %134 = vector.broadcast %133 : vector<1x128xi1> to vector<16x128xi1>
    %135 = vector.broadcast %cst_62 : f32 to vector<16x128xf32>
    %136 = arith.select %134, %131, %135 : vector<16x128xi1>, vector<16x128xf32>
    %c8 = arith.constant 8 : index
    %c0_63 = arith.constant 0 : index
    %c0_64 = arith.constant 0 : index
    %137 = vector.load %arg6[%c8, %c0_63, %c0_64] : memref<9x32x16xf32, #tpu.memory_space<vmem>>, vector<1x32x16xf32>
    %138 = vector.shape_cast %137 : vector<1x32x16xf32> to vector<32x16xf32>
    %cst_65 = arith.constant dense<0.000000e+00> : vector<32x128xf32>
    %139 = tpu.matmul %138, %136, %cst_65 {dimension_numbers = #tpu.dot_dimension_numbers<[1], [0], [0], [1], [0, 0, 1, 1], [], []>} : vector<32x16xf32>, vector<16x128xf32>, vector<32x128xf32> -> vector<32x128xf32>
    %140 = arith.addf %130, %139 : vector<32x128xf32>
    %cst_66 = arith.constant 0.000000e+00 : f32
    %141 = vector.broadcast %cst_66 : f32 to vector<32x128xf32>
    %142 = arith.maximumf %140, %141 : vector<32x128xf32>
    %c0_67 = arith.constant 0 : index
    %c0_68 = arith.constant 0 : index
    %143 = vector.load %arg7[%c0_67, %c0_68] : memref<8x32xf32, #tpu.memory_space<vmem>>, vector<8x32xf32>
    %cst_69 = arith.constant dense<0.000000e+00> : vector<8x128xf32>
    %144 = tpu.matmul %143, %142, %cst_69 {dimension_numbers = #tpu.dot_dimension_numbers<[1], [0], [0], [1], [0, 0, 1, 1], [], []>} : vector<8x32xf32>, vector<32x128xf32>, vector<8x128xf32> -> vector<8x128xf32>
    %c0_70 = arith.constant 0 : index
    %c0_71 = arith.constant 0 : index
    %145 = vector.load %arg8[%c0_70, %c0_71] : memref<8x1xf32, #tpu.memory_space<vmem>>, vector<8x1xf32>
    %146 = vector.broadcast %145 : vector<8x1xf32> to vector<8x128xf32>
    %147 = arith.addf %144, %146 : vector<8x128xf32>
    %c0_72 = arith.constant 0 : index
    %c0_73 = arith.constant 0 : index
    %c0_74 = arith.constant 0 : index
    %148 = vector.load %arg9[%c0_72, %c0_73, %c0_74] : memref<1x8x128xf32, #tpu.memory_space<vmem>>, vector<1x8x128xf32>
    %149 = vector.shape_cast %148 : vector<1x8x128xf32> to vector<8x128xf32>
    %150 = vector.shape_cast %147 : vector<8x128xf32> to vector<1x8x128xf32>
    tpu.vector_store %arg9[%c0_72, %c0_73, %c0_74], %150 {strides = array<i32>} : memref<1x8x128xf32, #tpu.memory_space<vmem>>, vector<1x8x128xf32>,
    return
  }
  func.func @transform_0(%arg0: i32) -> (i32, i32, i32) {
    %c0_i32 = arith.constant 0 : i32
    %c0_i32_0 = arith.constant 0 : i32
    %c0_i32_1 = arith.constant 0 : i32
    return %arg0, %c0_i32, %c0_i32_0 : i32, i32, i32
  }
  func.func @transform_1(%arg0: i32) -> (i32, i32) {
    %c0_i32 = arith.constant 0 : i32
    %c0_i32_0 = arith.constant 0 : i32
    %c0_i32_1 = arith.constant 0 : i32
    return %c0_i32, %c0_i32_0 : i32, i32
  }
  func.func @transform_2(%arg0: i32) -> (i32, i32) {
    %c0_i32 = arith.constant 0 : i32
    %c0_i32_0 = arith.constant 0 : i32
    %c0_i32_1 = arith.constant 0 : i32
    return %c0_i32, %c0_i32_0 : i32, i32
  }
  func.func @transform_3(%arg0: i32) -> (i32, i32) {
    %c0_i32 = arith.constant 0 : i32
    %c0_i32_0 = arith.constant 0 : i32
    %c0_i32_1 = arith.constant 0 : i32
    return %c0_i32, %c0_i32_0 : i32, i32
  }
  func.func @transform_4(%arg0: i32) -> (i32, i32) {
    %c0_i32 = arith.constant 0 : i32
    %c0_i32_0 = arith.constant 0 : i32
    %c0_i32_1 = arith.constant 0 : i32
    return %c0_i32, %c0_i32_0 : i32, i32
  }
  func.func @transform_5(%arg0: i32) -> (i32, i32, i32) {
    %c0_i32 = arith.constant 0 : i32
    %c0_i32_0 = arith.constant 0 : i32
    %c0_i32_1 = arith.constant 0 : i32
    %c0_i32_2 = arith.constant 0 : i32
    return %c0_i32, %c0_i32_0, %c0_i32_1 : i32, i32, i32
  }
  func.func @transform_6(%arg0: i32) -> (i32, i32) {
    %c0_i32 = arith.constant 0 : i32
    %c0_i32_0 = arith.constant 0 : i32
    %c0_i32_1 = arith.constant 0 : i32
    return %c0_i32, %c0_i32_0 : i32, i32
  }
  func.func @transform_7(%arg0: i32) -> (i32, i32) {
    %c0_i32 = arith.constant 0 : i32
    %c0_i32_0 = arith.constant 0 : i32
    %c0_i32_1 = arith.constant 0 : i32
    return %c0_i32, %c0_i32_0 : i32, i32
  }
  func.func @transform_8(%arg0: i32) -> (i32, i32, i32) {
    %c0_i32 = arith.constant 0 : i32
    %c0_i32_0 = arith.constant 0 : i32
    %c0_i32_1 = arith.constant 0 : i32
    return %arg0, %c0_i32, %c0_i32_0 : i32, i32, i32
  }
  func.func @transform_9(%arg0: i32) -> (i32, i32, i32) {
    %c0_i32 = arith.constant 0 : i32
    %c0_i32_0 = arith.constant 0 : i32
    %c0_i32_1 = arith.constant 0 : i32
    return %arg0, %c0_i32, %c0_i32_0 : i32, i32, i32
  }
}

</mosaic_0001>

<bundles_post_ra>
// kernel: tpu_custom_call.1
= control target key start
LH: loop header
LB: loop body
LE: loop exit
PB: predicated region body
PF: predicated region fallthrough
CT: control target
= control target key end

     0   :  { %15 = vsyncpa [#allocation3], 0  ;;  %vm41_vm0 = vcmask 64512   ;;  %v1839_v2 = vmov 0.0   ;;  %vm1840_vm1 = vmmov 0   ;;  %s2212_s0 = inlined_call_operand.vmem [shape: f32[1,8,128], index: 0, kind: input, shape index: {}]   ;;  %s2213_s1 = inlined_call_operand.vmem [shape: f32[4,8], index: 1, kind: input, shape index: {}]   ;;  %s2214_s2 = inlined_call_operand.vmem [shape: f32[4,1], index: 2, kind: input, shape index: {}]   ;;  %s2215_s3 = inlined_call_operand.vmem [shape: f32[16,4], index: 3, kind: input, shape index: {}]   ;;  %s2216_s4 = inlined_call_operand.vmem [shape: f32[16,1], index: 4, kind: input, shape index: {}]   ;;  %s2217_s5 = inlined_call_operand.vmem [shape: f32[9,32,16], index: 5, kind: input, shape index: {}]   ;;  %s2218_s6 = inlined_call_operand.vmem [shape: f32[8,32], index: 6, kind: input, shape index: {}]   ;;  %s2219_s7 = inlined_call_operand.vmem [shape: f32[8,1], index: 7, kind: input, shape index: {}]   ;;  %s2220_s8 = inlined_call_operand.hbm [shape: f32[1,8,128], index: 8, kind: output, shape index: {0}]   ;;  %s2221_s9 = inlined_call_operand.hbm [shape: f32[1,16,128], index: 9, kind: output, shape index: {1}]  }
   0x1   :  { %v34_v0 = vld [vmem:[%s2212_s0] sm:$0xff]  ;;  %1533 = vmatprep.subr.mxu0 %v1839_v2  ;;  %1535 = vmatprep.mubr.msk.f32.mxu0 %vm1840_vm1, %v1839_v2 }
   0x2   :  { %v33_v1 = vld [vmem:[%s2213_s1] sm:$0xf] }
   0x3   :  { %v35_v3 = vld [vmem:[%s2214_s2] sm:$0xf] }
   0x4   :  { %16 = vsyncpa [#allocation5], 0  ;;  %1534 = vmatpush3.msra.mxu0 %v34_v0  ;;  %v1841_v4 = vmov 0   ;;  %v118_v5 = vld [vmem:[%s2216_s4] sm:$0xff]  ;;  %vm130_vm2 = vcmask 31744   ;;  %v119_v7 = vld [vmem:[%s2216_s4 + $0x8] sm:$0xff]  ;;  %v220_v31 = vlaneseq }
   0x5   :  { %1749 = vset.pattern.permute.xlu0 %v1841_v4  ;;  %1536 = vmatmul.mubr.msk.f32.vlgmr.msra.gmra.mrb[0].mxu0 %vm41_vm0, %v33_v1  ;;  %v116_v6 = vld [vmem:[%s2215_s3] sm:$0xff]  ;;  %vm137_vm3 = vcmask 1043456   ;;  %v117_v13 = vld [vmem:[%s2215_s3 + $0x8] sm:$0xff]  ;;  %vm276_vm4 = vcmask 130048   ;;  %s1842_s3 = smov 127   ;;  %s1843_s23 = smov 8  }
   0x6   :  { %38 = vperm.xlu0 %1749, %v35_v3   ;;  %1750 = vset.pattern.permute.xlu1 %v1841_v4  ;;  %v1420_v14 = vld [vmem:[%s2217_s5 + $0x80] sm:$0xff]  ;;  %v1421_v26 = vld [vmem:[%s2217_s5 + $0x88] sm:$0xff]  ;;  %v1422_v27 = vld [vmem:[%s2217_s5 + $0x90] sm:$0xff]  ;;  %s1844_s28 = smov 121   ;;  %s1845_s29 = smov 9   ;;  %v221_v32 = vand.u32 127, %v220_v31 }
   0x7   :  { %1540 = vmatprep.mubr.msk.f32.mxu1 %vm130_vm2, %v116_v6  ;;  %127 = vperm.xlu1 %1750, %v119_v7   ;;  %v1384_v20 = vld [vmem:[%s2217_s5 + $0x20] sm:$0xff]  ;;  %v1423_v28 = vld [vmem:[%s2217_s5 + $0x98] sm:$0xff]  ;;  %s1846_s13 = smov 120   ;;  %s1847_s14 = smov 7   ;;  %v1385_v54 = vld [vmem:[%s2217_s5 + $0x28] sm:$0xff] }
   0x8   :  { %1587 = vmatprep.mubr.msk.f32.mxu0 %vm276_vm4, %v1420_v14  ;;  %v1428_v29 = vld [vmem:[%s2217_s5 + $0xa0] sm:$0xff]  ;;  %s1848_s0 = smov 119   ;;  %s1849_s1 = smov 1   ;;  %v226_v33 = vand.u32 63, %v221_v32  ;;  %v238_v34 = vand.u32 7, %v221_v32  ;;  %v1429_v58 = vld [vmem:[%s2217_s5 + $0xa8] sm:$0xff] }
   0x9   :  { %v1269_v30 = vld [vmem:[%s2219_s7] sm:$0xff]  ;;  %v1386_v1 = vld [vmem:[%s2217_s5 + $0x30] sm:$0xff]  ;;  %v1387_v4 = vld [vmem:[%s2217_s5 + $0x38] sm:$0xff] }
   0xa   :  { %122 = vperm.xlu0 %1749, %v118_v5   ;;  %vm1956_vm5 = vcmp.ge.s32.totalorder %v226_v33, 8  ;;  %vm1960_vm6 = vcmp.ne.s32.totalorder %v238_v34, 7  ;;  %vm1964_vm7 = vcmp.ne.s32.totalorder %v238_v34, 0  ;;  %vm1971_vm9 = vcmp.lt.s32.totalorder %v226_v33, 56  ;;  %v1430_v3 = vld [vmem:[%s2217_s5 + $0xb0] sm:$0xff]  ;;  %v1403_v32 = vld [vmem:[%s2217_s5 + $0x58] sm:$0xff] }
   0xb   :  { %vm1645_vm8 = vmpackc.low %vm1956_vm5, %vm1956_vm5  ;;  %v1450_v31 = vld [vmem:[%s2217_s5 + $0xf0] sm:$0xff]  ;;  %v1451_v33 = vld [vmem:[%s2217_s5 + $0xf8] sm:$0xff] }
   0xc   :  { %vm1673_vm10 = vmpackc.low %vm1960_vm6, %vm1960_vm6  ;;  %v1410_v34 = vld [vmem:[%s2217_s5 + $0x60] sm:$0xff]  ;;  %v1411_v36 = vld [vmem:[%s2217_s5 + $0x68] sm:$0xff] }
   0xd   :  { %vm254_vm11 = vmand %vm1956_vm5, %vm1964_vm7  ;;  %v1458_v35 = vld [vmem:[%s2217_s5 + $0x100] sm:$0xff]  ;;  %v1459_v37 = vld [vmem:[%s2217_s5 + $0x108] sm:$0xff] }
   0xe   :  { %vm924_vm12 = vmand %vm1971_vm9, %vm1964_vm7  ;;  %v1413_v40 = vld [vmem:[%s2217_s5 + $0x78] sm:$0xff] }
   0xf   :  { %vm1991_vm13 = vmpackc.low %vm254_vm11, %vm254_vm11 }
  0x10   :  { %vm2003_vm14 = vmpackc.low %vm924_vm12, %vm924_vm12 }
  0x11   :  { %vm475_vm15 = vmand %vm1956_vm5, %vm1960_vm6 }
  0x12   :  { %vm2029_vm0 = vmpackc.low %vm475_vm15, %vm475_vm15 }
  0x13   :  { %vm1663_vm5 = vmpackc.low %vm1964_vm7, %vm1964_vm7 }
  0x85   :  { %v39_v8 = vpop.permute.xlu0 %38 }
  0x86   :  { %v128_v15 = vpop.permute.xlu1 %127 }
  0x89   :  { %v123_v17 = vpop.permute.xlu0 %122 }
  0xd8   :  { %v111_v9 = vpop.f32.mrb[0].mxu0 }
  0xd9   :  { %v112_v10 = vadd.f32 %v111_v9, %v39_v8  ;;  %v1537_v11 = vpop.f32.mrb[1].mxu0  ;;  %v1431_v8 = vld [vmem:[%s2217_s5 + $0xb8] sm:$0xff] }
  0xda   :  { %v259_v11 = vld [vmem:[%s2217_s5] sm:$0xff] }
  0xdb   :  { %v115_v12 = vmax.f32 %v112_v10, 0.0 }
  0xdd   :  { %1538 = vmatprep.subr.msk.mxu1 %vm137_vm3, %v115_v12 }
  0xde   :  { %1539 = vmatpush3.msk.msra.mxu1 %vm137_vm3, %v115_v12  ;;  %v1438_v12 = vld [vmem:[%s2217_s5 + $0xc0] sm:$0xff]  ;;  %vm1153_vm3 = vmand %vm1971_vm9, %vm1960_vm6 }
  0xdf   :  { %1541 = vmatmul.mubr.msk.f32.vlgmr.msra.gmra.mrb[0].mxu1 %vm130_vm2, %v117_v13  ;;  %vm1685_vm2 = vmpackc.low %vm1971_vm9, %vm1971_vm9 }
  0xe0   :  { %1547 = vmatprep.mubr.msk.f32.mxu1 %vm276_vm4, %v1384_v20 }
 0x1b2   :  { %v1542_v16 = vpop.f32.mrb[0].mxu1 }
 0x1b3   :  { %v213_v18 = vadd.f32 %v1542_v16, %v128_v15  ;;  %v207_v19 = vpop.f32.mrb[1].mxu1 }
 0x1b4   :  { %v208_v21 = vadd.f32 %v207_v19, %v123_v17  ;;  %v260_v17 = vld [vmem:[%s2217_s5 + $0x8] sm:$0xff] }
 0x1b5   :  { %v217_v22 = vmax.f32 %v213_v18, 0.0  ;;  %v1439_v19 = vld [vmem:[%s2217_s5 + $0xc8] sm:$0xff] }
 0x1b6   :  { %v216_v23 = vmax.f32 %v208_v21, 0.0 }
 0x1b7   :  { %219 = vst [vmem:[#allocation4 + $0x8] sm:$0xff] %v217_v22 }
 0x1b8   :  { %218 = vst [vmem:[#allocation4] sm:$0xff] %v216_v23  ;;  %v1756_v24 = vpack.i.bf16 %v217_v22, %v216_v23  ;;  %v1668_v25 = vpack.c.bf16 %v217_v22, %v216_v23  ;;  %v261_v22 = vld [vmem:[%s2217_s5 + $0x10] sm:$0xff] }
 0x1b9   :  { %v1440_v23 = vld [vmem:[%s2217_s5 + $0xd0] sm:$0xff] }
 0x1ba   :  { %1757 = vrot.lane.b32.xlu0 %v1756_v24, %s1842_s3  ;;  %1752 = vrot.lane.b32.xlu1 %v1756_v24, %s1843_s23  ;;  %s1851_s3 = smov [#allocation4]  }
 0x1bb   :  { %1669 = vmatprep.subr.bf16.mxu0 %v1668_v25  ;;  %s1365_s24 = sshll.u32 %s1851_s3, 4  ;;  %s1366_s24 = int_to_ptr.vmem [resolvable:$true] %s1365_s24 }
 0x1bc   :  { %1671 = vmatpush3.bf16.msra.mxu0 %v1668_v25  ;;  %v1441_v25 = vld [vmem:[%s2217_s5 + $0xd8] sm:$0xff]  ;;  %s1791_s25 = scalar_lea.vmem %s1366_s24, 256  ;;  %p1796_p1 = scmp.lt.s32.totalorder %s1366_s24, %s1366_s24 }
 0x1bd   :  { %p1792_p0 = scmp.ne.s32.totalorder %s1366_s24, %s1791_s25  ;;  %p1797_p2 = scmp.lt.s32.totalorder %s1791_s25, %s1791_s25 }
 0x1be   :  { %1767 = vrot.lane.b32.xlu0 %v1756_v24, %s1844_s28  ;;  %1762 = vrot.lane.b32.xlu1 %v1756_v24, %s1845_s29 }
 0x1bf   :  { %1588 = vmatmul.mubr.msk.f32.vlgmr.msra.gmra.mrb[2].mxu0 %vm276_vm4, %v1421_v26  ;;  %v1400_v26 = vld [vmem:[%s2217_s5 + $0x40] sm:$0xff]  ;;  %p1798_p3 = por %p1797_p2, %p1796_p1 }
 0x1c0   :  { %1590 = vmatprep.mubr.msk.f32.mxu0 %vm276_vm4, %v1422_v27  ;;  %v1448_v27 = vld [vmem:[%s2217_s5 + $0xe0] sm:$0xff] }
 0x1c1   :  { %p1799_p4 = pnand %p1798_p3, %p1792_p0 }
 0x1c2   :  { %1777 = vrot.lane.b32.xlu0 %v1756_v24, %s1846_s13  ;;  %1772 = vrot.lane.b32.xlu1 %v1756_v24, %s1847_s14 }
 0x1c3   :  { %1591 = vmatmul.mubr.msk.f32.gmra.mrb[4].mxu0 %vm276_vm4, %v1423_v28  ;;  %v1401_v28 = vld [vmem:[%s2217_s5 + $0x48] sm:$0xff] }
 0x1c4   :  { %1597 = vmatprep.mubr.msk.f32.mxu0 %vm276_vm4, %v1428_v29  ;;  %v1449_v29 = vld [vmem:[%s2217_s5 + $0xe8] sm:$0xff] }
 0x1c6   :  { %1787 = vrot.lane.b32.xlu0 %v1756_v24, %s1848_s0  ;;  %1782 = vrot.lane.b32.xlu1 %v1756_v24, %s1849_s1  ;;  %v262_v24 = vld [vmem:[%s2217_s5 + $0x18] sm:$0xff] }
 0x1ca   :  { %1272 = vperm.xlu1 %1750, %v1269_v30   ;;  %v1402_v30 = vld [vmem:[%s2217_s5 + $0x50] sm:$0xff] }
 0x22c   :  { %v1758_v38 = vpop.permute.xlu0 %1757  ;;  %v1753_v39 = vpop.permute.xlu1 %1752 }
 0x22d   :  { %v1760_v41 = vunpack.i.h.bf16 %v1758_v38  ;;  %v1759_v42 = vunpack.i.l.bf16 %v1758_v38  ;;  %v1755_v43 = vunpack.i.h.bf16 %v1753_v39  ;;  %v1754_v44 = vunpack.i.l.bf16 %v1753_v39  ;;  %v1412_v38 = vld [vmem:[%s2217_s5 + $0x70] sm:$0xff] }
 0x22e   :  { %v1460_v39 = vld [vmem:[%s2217_s5 + $0x110] sm:$0xff] }
 0x22f   :  { %v1672_v45 = vpack.c.bf16 %v1760_v41, %v1759_v42  ;;  %v1644_v46 = vpack.c.bf16 %v1755_v43, %v1754_v44  ;;  %v1461_v41 = vld [vmem:[%s2217_s5 + $0x118] sm:$0xff]  ;;  %v1850_v42 = vmov 0.0|0.0  }
 0x230   :  { %v1768_v47 = vpop.permute.xlu0 %1767  ;;  %v1763_v48 = vpop.permute.xlu1 %1762 }
 0x231   :  { %v1770_v49 = vunpack.i.h.bf16 %v1768_v47  ;;  %v1769_v50 = vunpack.i.l.bf16 %v1768_v47  ;;  %v1765_v51 = vunpack.i.h.bf16 %v1763_v48  ;;  %v1764_v52 = vunpack.i.l.bf16 %v1763_v48  ;;  %1646 = vmatprep.subr.msk.bf16.mxu1 %vm1645_vm8, %v1644_v46  ;;  %1674 = vmatprep.subr.msk.bf16.mxu0 %vm1673_vm10, %v1672_v45 }
 0x232   :  { %1649 = vmatpush3.bf16.msk.msra.mxu1 %vm1645_vm8, %v1644_v46  ;;  %1677 = vmatpush3.bf16.msk.msra.mxu0 %vm1673_vm10, %v1672_v45  ;;  %vm2076_vm8 = vmpackc.low %vm1153_vm3, %vm1153_vm3 }
 0x233   :  { %v1678_v56 = vpack.c.bf16 %v1770_v49, %v1769_v50  ;;  %v1650_v57 = vpack.c.bf16 %v1765_v51, %v1764_v52 }
 0x234   :  { %v1778_v59 = vpop.permute.xlu0 %1777  ;;  %v1773_v60 = vpop.permute.xlu1 %1772 }
 0x235   :  { %v1780_v61 = vunpack.i.h.bf16 %v1778_v59  ;;  %v1779_v62 = vunpack.i.l.bf16 %v1778_v59  ;;  %v1775_v63 = vunpack.i.h.bf16 %v1773_v60  ;;  %v1774_v0 = vunpack.i.l.bf16 %v1773_v60  ;;  %1548 = vmatmul.mubr.msk.f32.vlgmr.msra.gmra.mrb[2].mxu1 %vm276_vm4, %v1385_v54  ;;  %1652 = vmatprep.subr.msk.bf16.mxu1 %vm1991_vm13, %v1650_v57  ;;  %v1268_v60 = vld [vmem:[%s2218_s6] sm:$0xff] }
 0x236   :  { %1598 = vmatmul.mubr.msk.f32.vlgmr.msra.gmra.mrb[2].mxu0 %vm276_vm4, %v1429_v58  ;;  %1680 = vmatprep.subr.msk.bf16.mxu0 %vm2003_vm14, %v1678_v56 }
 0x237   :  { %v1684_v6 = vpack.c.bf16 %v1780_v61, %v1779_v62  ;;  %v1656_v7 = vpack.c.bf16 %v1775_v63, %v1774_v0  ;;  %1655 = vmatpush3.bf16.msk.msra.mxu1 %vm1991_vm13, %v1650_v57  ;;  %1683 = vmatpush3.bf16.msk.msra.mxu0 %vm2003_vm14, %v1678_v56 }
 0x238   :  { %v1788_v9 = vpop.permute.xlu0 %1787  ;;  %v1783_v10 = vpop.permute.xlu1 %1782  ;;  %1550 = vmatprep.mubr.msk.f32.mxu1 %vm276_vm4, %v1386_v1  ;;  %1600 = vmatprep.mubr.msk.f32.mxu0 %vm276_vm4, %v1430_v3 }
 0x239   :  { %v1790_v13 = vunpack.i.h.bf16 %v1788_v9  ;;  %v1789_v14 = vunpack.i.l.bf16 %v1788_v9  ;;  %v1785_v15 = vunpack.i.h.bf16 %v1783_v10  ;;  %v1784_v16 = vunpack.i.l.bf16 %v1783_v10  ;;  %1551 = vmatmul.mubr.msk.f32.gmra.mrb[4].mxu1 %vm276_vm4, %v1387_v4  ;;  %1658 = vmatprep.subr.msk.bf16.mxu1 %vm2029_vm0, %v1656_v7 }
 0x23a   :  { %1601 = vmatmul.mubr.msk.f32.gmra.mrb[4].mxu0 %vm276_vm4, %v1431_v8  ;;  %1686 = vmatprep.subr.msk.bf16.mxu0 %vm1685_vm2, %v1684_v6 }
 0x23b   :  { %v1662_v18 = vpack.c.bf16 %v1785_v15, %v1784_v16  ;;  %1557 = vmatprep.mubr.msk.f32.mxu1 %vm276_vm4, %v259_v11  ;;  %1607 = vmatprep.mubr.msk.f32.mxu0 %vm276_vm4, %v1438_v12  ;;  %v1690_v20 = vpack.c.bf16 %v1790_v13, %v1789_v14 }
 0x23d   :  { %1558 = vmatmul.mubr.msk.f32.vlgmr.msra.gmra.mrb[2].mxu1 %vm276_vm4, %v260_v17 }
 0x23e   :  { %1661 = vmatpush3.bf16.msk.msra.mxu1 %vm2029_vm0, %v1656_v7  ;;  %1608 = vmatmul.mubr.msk.f32.vlgmr.msra.gmra.mrb[2].mxu0 %vm276_vm4, %v1439_v19 }
 0x23f   :  { %1689 = vmatpush3.bf16.msk.msra.mxu0 %vm1685_vm2, %v1684_v6  ;;  %1664 = vmatprep.subr.msk.bf16.mxu1 %vm1663_vm5, %v1662_v18 }
 0x240   :  { %1692 = vmatprep.subr.msk.bf16.mxu0 %vm2076_vm8, %v1690_v20  ;;  %1560 = vmatprep.mubr.msk.f32.mxu1 %vm276_vm4, %v261_v22 }
 0x241   :  { %1610 = vmatprep.mubr.msk.f32.mxu0 %vm276_vm4, %v1440_v23  ;;  %1561 = vmatmul.mubr.msk.f32.gmra.mrb[4].mxu1 %vm276_vm4, %v262_v24 }
 0x242   :  { %1611 = vmatmul.mubr.msk.f32.gmra.mrb[4].mxu0 %vm276_vm4, %v1441_v25  ;;  %1567 = vmatprep.mubr.msk.f32.mxu1 %vm276_vm4, %v1400_v26 }
 0x243   :  { %1617 = vmatprep.mubr.msk.f32.mxu0 %vm276_vm4, %v1448_v27 }
 0x245   :  { %1568 = vmatmul.mubr.msk.f32.vlgmr.msra.gmra.mrb[2].mxu1 %vm276_vm4, %v1401_v28 }
 0x246   :  { %1667 = vmatpush3.bf16.msk.msra.mxu1 %vm1663_vm5, %v1662_v18  ;;  %1618 = vmatmul.mubr.msk.f32.vlgmr.msra.gmra.mrb[2].mxu0 %vm276_vm4, %v1449_v29 }
 0x247   :  { %1695 = vmatpush3.bf16.msk.msra.mxu0 %vm2076_vm8, %v1690_v20  ;;  %1570 = vmatprep.mubr.msk.f32.mxu1 %vm276_vm4, %v1402_v30 }
 0x248   :  { %1620 = vmatprep.mubr.msk.f32.mxu0 %vm276_vm4, %v1450_v31  ;;  %1696 = vmatprep.subr.bf16.mxu1 %v1850_v42 }
 0x249   :  { %1571 = vmatmul.mubr.msk.f32.gmra.mrb[4].mxu1 %vm276_vm4, %v1403_v32 }
 0x24a   :  { %1621 = vmatmul.mubr.msk.f32.gmra.mrb[4].mxu0 %vm276_vm4, %v1451_v33  ;;  %1577 = vmatprep.mubr.msk.f32.mxu1 %vm276_vm4, %v1410_v34 }
 0x24b   :  { %1627 = vmatprep.mubr.msk.f32.mxu0 %vm276_vm4, %v1458_v35 }
 0x24d   :  { %1578 = vmatmul.mubr.msk.f32.vlgmr.msra.gmra.mrb[2].mxu1 %vm276_vm4, %v1411_v36 }
 0x24e   :  { %1628 = vmatmul.mubr.msk.f32.vlgmr.msra.gmra.mrb[2].mxu0 %vm276_vm4, %v1459_v37  ;;  %1580 = vmatprep.mubr.msk.f32.mxu1 %vm276_vm4, %v1412_v38 }
 0x24f   :  { %1630 = vmatprep.mubr.msk.f32.mxu0 %vm276_vm4, %v1460_v39 }
 0x251   :  { %1581 = vmatmul.mubr.msk.f32.gmra.mrb[4].mxu1 %vm276_vm4, %v1413_v40 }
 0x252   :  { %1631 = vmatmul.mubr.msk.f32.gmra.mrb[4].mxu0 %vm276_vm4, %v1461_v41  ;;  %1641 = vmatprep.mubr.msk.f32.mxu1 %vm1840_vm1, %v1839_v2  ;;  %vm1275_vm1 = vcmask 261120  }
 0x320   :  { %v1579_v43 = vpop.f32.mrb[2].mxu1 }
 0x321   :  { %v1629_v44 = vpop.f32.mrb[2].mxu0  ;;  %v677_v45 = vpop.f32.mrb[3].mxu1 }
 0x322   :  { %v1702_v46 = vadd.f32 %v1629_v44, %v1579_v43  ;;  %v1241_v47 = vpop.f32.mrb[3].mxu0 }
 0x323   :  { %v1703_v48 = vadd.f32 %v1241_v47, %v677_v45 }
 0x324   :  { %v1265_v49 = vmax.f32 %v1702_v46, 0.0  ;;  %v1582_v50 = vpop.f32.mrb[4].mxu1 }
 0x325   :  { %v1264_v51 = vmax.f32 %v1703_v48, 0.0  ;;  %v1632_v52 = vpop.f32.mrb[4].mxu0  ;;  %v687_v53 = vpop.f32.mrb[5].mxu1 }
 0x326   :  { %v1704_v54 = vadd.f32 %v1632_v52, %v1582_v50  ;;  %v1251_v55 = vpop.f32.mrb[5].mxu0 }
 0x327   :  { %v1697_v56 = vpack.c.bf16 %v1265_v49, %v1264_v51  ;;  %v1705_v57 = vadd.f32 %v1251_v55, %v687_v53 }
 0x328   :  { %v1267_v58 = vmax.f32 %v1704_v54, 0.0 }
 0x329   :  { %v1266_v59 = vmax.f32 %v1705_v57, 0.0  ;;  %1698 = vmatpush3.bf16.msra.mxu1 %v1697_v56 }
 0x32a   :  { %1699 = vmatprep.subr.bf16.mxu1 %v1850_v42 }
 0x32b   :  { %v1700_v2 = vpack.c.bf16 %v1267_v58, %v1266_v59 }
 0x32d   :  { %1701 = vmatpush3.bf16.msra.mxu1 %v1700_v2 }
 0x330   :  { %1642 = vmatmul.mubr.msk.f32.vlgmr.msra.gmra.mrb[6].mxu1 %vm1275_vm1, %v1268_v60 }
 0x331   :  { %1802 = shalt.err (!%p1799_p4)
}
 0x332   :  { %s1803_s28 = scalar_lea.hbm %s2221_s9, 256 }
 0x333   :  { %p1804_p5 = scmp.ne.s32.totalorder %s2221_s9, %s1803_s28  ;;  %p1807_p6 = scmp.lt.u32.totalorder %s1803_s28, %s2221_s9 }
 0x335   :  { %p1809_p7 = pnand %p1807_p6, %p1804_p5 }
 0x337   :  { %1812 = shalt.err (!%p1809_p7)
}
 0x338   :  { %s1852_s11 = smov 128   ;;  %s1853_s14 = smov [#allocation2]   ;;  %v1273_v61 = vpop.permute.xlu1 %1272 }
 0x339   :  { %1371 = dma.vmem_to_hbm [thread:$0]  %s1366_s24, 256, %s2221_s9, [#allocation5], %s1852_s11, %s1852_s11, %s1843_s23  }
 0x33a   :  { %s1356_s0 = sshll.u32 %s1853_s14, 4  ;;  %s1357_s0 = int_to_ptr.vmem [resolvable:$true] %s1356_s0 }
 0x33b   :  { %s1813_s1 = scalar_lea.vmem %s1357_s0, 128  ;;  %p1818_p9 = scmp.lt.s32.totalorder %s1357_s0, %s1357_s0 }
 0x33c   :  { %p1814_p8 = scmp.ne.s32.totalorder %s1357_s0, %s1813_s1  ;;  %p1819_p10 = scmp.lt.s32.totalorder %s1813_s1, %s1813_s1 }
 0x33e   :  { %p1820_p11 = por %p1819_p10, %p1818_p9 }
 0x340   :  { %p1821_p12 = pnand %p1820_p11, %p1814_p8 }
 0x403   :  { %v1345_v62 = vpop.f32.mrb[6].mxu1 }
 0x404   :  { %v1346_v63 = vadd.f32 %v1345_v62, %v1273_v61  ;;  %v1643_v0 = vpop.f32.mrb[7].mxu1 }
 0x406   :  { %1349 = vst [vmem:[#allocation2] sm:$0xff] %v1346_v63 }
 0x407   :  { %1824 = shalt.err (!%p1821_p12)
}
 0x408   :  { %s1825_s7 = scalar_lea.hbm %s2220_s8, 128 }
 0x409   :  { %p1826_p13 = scmp.ne.s32.totalorder %s2220_s8, %s1825_s7  ;;  %p1829_p0 = scmp.lt.u32.totalorder %s1825_s7, %s2220_s8 }
 0x40b   :  { %p1831_p1 = pnand %p1829_p0, %p1826_p13 }
 0x40d   :  { %1834 = shalt.err (!%p1831_p1)
}
 0x40e   :  { %1359 = dma.vmem_to_hbm [thread:$0]  %s1357_s0, 128, %s2220_s8, [#allocation3]  }
 0x40f   :  { %1835 = dma.done.wait [#allocation3], 128  }
 0x410   :  { %1836 = vsyncadd [#allocation3], 4294967168 }
 0x411   :  { %1837 = dma.done.wait [#allocation5], 256  }
 0x412   :  { %1838 = vsyncadd [#allocation5], 4294967040 }
 0x413   :  { %1378 = vsyncpa [#allocation3], 1 }
 0x414   :  { %1379 = vsyncpa [#allocation5], 1 }

</bundles_post_ra>
